<compile_context>
chip_gen: v5e
topology: v5e:2x2
jax: 0.10.0
libtpu: 0.0.40
codegen_flags: <defaults>
</compile_context>

<pallas_src>
import functools

import jax
import jax.numpy as jnp
import numpy as np
from jax.experimental import pallas as pl
from jax.experimental.pallas import tpu as pltpu


# -----------------------------------------------------------------------------
# Fused kernel: all timesteps, all GCN layers, and the final Linear.
# -----------------------------------------------------------------------------
def _fused_gcn_kernel(adj_ref, feat_ref, *refs, T, N, n_layers, cast_bf16):
    # refs = (w_0, b_0, ..., w_{L-1}, b_{L-1}, lin_w, lin_b, o_ref)
    *layer_refs, lin_w_ref, lin_b_ref, o_ref = refs

    compute_dt = jnp.bfloat16 if cast_bf16 else jnp.float32

    def mm(a, b):
        # astype is a no-op for operands already pre-cast in the wrapper;
        # accumulate in f32 on the MXU.
        return jnp.dot(a.astype(compute_dt), b.astype(compute_dt),
                       preferred_element_type=jnp.float32)

    h_all = feat_ref[...]                               # [T*N, F_in]
    x = None
    for li in range(n_layers):                          # unrolled (static)
        w = layer_refs[2 * li][...]                     # [F_l, F_{l+1}]
        b = layer_refs[2 * li + 1][...]                 # [1, F_{l+1}] (f32)

        # One batched MXU push for the shared-weight stage across all timesteps.
        hw_all = mm(h_all, w)                           # [T*N, F_{l+1}], f32

        outs = []
        for t in range(T):                              # per-timestep adjacency
            h_t = mm(adj_ref[t], hw_all[t * N:(t + 1) * N, :]) + b   # f32 bias
            if li < n_layers - 1:
                h_t = jnp.maximum(h_t, 0.0)             # ReLU in f32
            outs.append(h_t)

        if li < n_layers - 1:
            h_all = jnp.concatenate(outs, axis=0)       # [T*N, F_hid]
        else:
            # torch.cat(..., dim=1): columns ordered t = 0..T-1.
            x = jnp.concatenate(outs, axis=1)           # [N, T*gcn_out]

    # Single final Linear (K = T*gcn_out), written straight to the output ref.
    o_ref[...] = (mm(x, lin_w_ref[...]) + lin_b_ref[...]).astype(o_ref.dtype)


def _vmem_spec():
    # whole array, resident in VMEM (no grid -> single invocation)
    return pl.BlockSpec(memory_space=pltpu.MemorySpace.VMEM)


def gcn_baseline_forward(params, g1, features1, g2, features2, time_split,
                         *, cast_bf16=False):
    """Fused forward: a single pallas_call (no grid)."""
    del g2, features2                      # unused, mirroring the PyTorch forward
    T = int(time_split)
    N = g1.shape[1]
    f_in = features1.shape[2]
    gcn_params = params["gcn"]
    n_layers = len(gcn_params)
    gcn_out = gcn_params[-1][0].shape[1]
    out_dim = params["lin_w_t"].shape[1]

    in_dt = jnp.bfloat16 if cast_bf16 else jnp.float32

    # bf16-in-HBM for the MXU operands (wrapper-side, not in-kernel VPU casts).
    adj = g1.astype(in_dt)                                   # [T, N, N]
    feat = features1.reshape(T * N, f_in).astype(in_dt)      # [T*N, F_in]

    weight_inputs = []
    for (w, b) in gcn_params:
        weight_inputs += [w.astype(in_dt), b.reshape(1, -1).astype(jnp.float32)]

    lin_w = params["lin_w_t"].astype(in_dt)                  # [T*gcn_out, out_dim]
    lin_b = params["lin_b"].reshape(1, out_dim).astype(jnp.float32)

    # Advisory cost estimate for XLA scheduling.
    flops = 0
    fi = f_in
    for (w, _b) in gcn_params:
        fo = w.shape[1]
        flops += 2 * T * N * fi * fo            # batched H @ W
        flops += 2 * T * N * N * fo             # A_hat @ (H W)
        fi = fo
    flops += 2 * N * (T * gcn_out) * out_dim    # final Linear
    all_inputs = [adj, feat, *weight_inputs, lin_w, lin_b]
    bytes_accessed = int(sum(a.size * a.dtype.itemsize for a in all_inputs)
                         + N * out_dim * 4)

    kernel = functools.partial(_fused_gcn_kernel, T=T, N=N,
                               n_layers=n_layers, cast_bf16=cast_bf16)

    return pl.pallas_call(
        kernel,
        out_shape=jax.ShapeDtypeStruct((N, out_dim), jnp.float32),
        in_specs=[_vmem_spec() for _ in all_inputs],
        out_specs=_vmem_spec(),
        cost_estimate=pl.CostEstimate(flops=int(flops),
                                      bytes_accessed=bytes_accessed,
                                      transcendentals=0),
    )(*all_inputs)


# -----------------------------------------------------------------------------
# Parameter setup / glue (plain JAX)
# -----------------------------------------------------------------------------
def init_params(key, gcn_in, gcn_hid, gcn_out, gcn_layers, out_dim, time_length):
    dims = (
        [gcn_in, gcn_out]
        if gcn_layers == 1
        else [gcn_in] + [gcn_hid] * (gcn_layers - 1) + [gcn_out]
    )
    params = {"gcn": []}
    for li in range(gcn_layers):
        key, kw = jax.random.split(key)
        fan_in, fan_out = dims[li], dims[li + 1]
        scale = jnp.sqrt(6.0 / (fan_in + fan_out))
        w = jax.random.uniform(kw, (fan_in, fan_out), jnp.float32, -scale, scale)
        b = jnp.zeros((fan_out,), jnp.float32)
        params["gcn"].append((w, b))
    lin_in = gcn_out * time_length
    key, kw, kb = jax.random.split(key, 3)
    bound = 1.0 / np.sqrt(lin_in)
    params["lin_w_t"] = jax.random.uniform(kw, (lin_in, out_dim), jnp.float32, -bound, bound)
    params["lin_b"] = jax.random.uniform(kb, (out_dim,), jnp.float32, -bound, bound)
    return params


def normalize_adj(a):
    """A_hat = D^{-1/2} (A + I) D^{-1/2}."""
    n = a.shape[0]
    a = a + jnp.eye(n, dtype=a.dtype)
    deg = jnp.sum(a, axis=1)
    d_inv_sqrt = 1.0 / jnp.sqrt(jnp.maximum(deg, 1e-12))
    return a * d_inv_sqrt[:, None] * d_inv_sqrt[None, :]


# -----------------------------------------------------------------------------
# Pure-JAX reference for correctness check
# -----------------------------------------------------------------------------
def reference_forward(params, g1, features1, time_split):
    outs = []
    n_layers = len(params["gcn"])
    for i in range(time_split):
        h = features1[i]
        for li, (w, b) in enumerate(params["gcn"]):
            h = g1[i] @ (h @ w) + b[None, :]
            if li < n_layers - 1:
                h = jnp.maximum(h, 0.0)
        outs.append(h)
    x = jnp.concatenate(outs, axis=1)
    return x @ params["lin_w_t"] + params["lin_b"][None, :]


if __name__ == "__main__":
    # small, forward-consistent shapes
    N = 16            # nodes per graph
    gcn_in = 8
    gcn_hid = 32
    gcn_out = 8
    gcn_layers = 2
    time_split = 4    # == time_length
    time_length = 4
    out_dim = 8

    key = jax.random.PRNGKey(0)
    key, k_adj, k_feat = jax.random.split(key, 3)

    params = init_params(key, gcn_in, gcn_hid, gcn_out, gcn_layers, out_dim, time_length)

    # random symmetric binary adjacencies per timestep, then normalized
    raw = jax.random.bernoulli(k_adj, 0.3, (time_split, N, N)).astype(jnp.float32)
    raw = jnp.maximum(raw, jnp.swapaxes(raw, 1, 2))
    g1 = jnp.stack([normalize_adj(raw[i]) for i in range(time_split)])   # [T, N, N]
    features1 = jax.random.normal(k_feat, (time_split, N, gcn_in), jnp.float32)

    # second (unused) graph/features, matching the PyTorch signature
    g2 = g1
    features2 = features1

    ref = reference_forward(params, g1, features1, time_split)

    # f32 MXU path (exact): tight tolerance against the pure-JAX reference
    out = gcn_baseline_forward(params, g1, features1, g2, features2, time_split,
                               cast_bf16=False)
    out = jax.block_until_ready(out)
    assert out.shape == (N, out_dim)
    np.testing.assert_allclose(np.asarray(out), np.asarray(ref), rtol=1e-4, atol=1e-4)

    # bf16-in-HBM MXU inputs / f32 accumulation (v6e / v7x path): looser tolerance
    out_bf16 = gcn_baseline_forward(params, g1, features1, g2, features2, time_split,
                                    cast_bf16=True)
    out_bf16 = jax.block_until_ready(out_bf16)
    np.testing.assert_allclose(np.asarray(out_bf16), np.asarray(ref), rtol=5e-2, atol=5e-2)

    print("KERNEL_OK")
</pallas_src>

<mosaic_0001>
module attributes {stable_mosaic.version = 11 : i64} {
  func.func @_fused_gcn_kernel(%arg0: memref<4x16x16xf32, #tpu.memory_space<vmem>>, %arg1: memref<64x8xf32, #tpu.memory_space<vmem>>, %arg2: memref<8x32xf32, #tpu.memory_space<vmem>>, %arg3: memref<1x32xf32, #tpu.memory_space<vmem>>, %arg4: memref<32x8xf32, #tpu.memory_space<vmem>>, %arg5: memref<1x8xf32, #tpu.memory_space<vmem>>, %arg6: memref<32x8xf32, #tpu.memory_space<vmem>>, %arg7: memref<1x8xf32, #tpu.memory_space<vmem>>, %arg8: memref<16x8xf32, #tpu.memory_space<vmem>>) attributes {dimension_semantics = [], scalar_prefetch = 0 : i64, scratch_operands = 0 : i64, tpu.core_type = #tpu.core_type<tc>} {
    %c0 = arith.constant 0 : index
    %c0_0 = arith.constant 0 : index
    %0 = vector.load %arg1[%c0, %c0_0] : memref<64x8xf32, #tpu.memory_space<vmem>>, vector<64x8xf32>
    %c0_1 = arith.constant 0 : index
    %c0_2 = arith.constant 0 : index
    %1 = vector.load %arg2[%c0_1, %c0_2] : memref<8x32xf32, #tpu.memory_space<vmem>>, vector<8x32xf32>
    %c0_3 = arith.constant 0 : index
    %c0_4 = arith.constant 0 : index
    %2 = vector.load %arg3[%c0_3, %c0_4] : memref<1x32xf32, #tpu.memory_space<vmem>>, vector<1x32xf32>
    %cst = arith.constant dense<0.000000e+00> : vector<64x32xf32>
    %3 = tpu.matmul %0, %1, %cst {dimension_numbers = #tpu.dot_dimension_numbers<[1], [0], [0], [1], [0, 0, 1, 1], [], []>} : vector<64x8xf32>, vector<8x32xf32>, vector<64x32xf32> -> vector<64x32xf32>
    %c0_5 = arith.constant 0 : index
    %c0_6 = arith.constant 0 : index
    %c0_7 = arith.constant 0 : index
    %4 = vector.load %arg0[%c0_5, %c0_6, %c0_7] : memref<4x16x16xf32, #tpu.memory_space<vmem>>, vector<1x16x16xf32>
    %5 = vector.shape_cast %4 : vector<1x16x16xf32> to vector<16x16xf32>
    %6 = vector.extract_strided_slice %3 {offsets = [0, 0], sizes = [16, 32], strides = [1, 1]} : vector<64x32xf32> to vector<16x32xf32>
    %cst_8 = arith.constant dense<0.000000e+00> : vector<16x32xf32>
    %7 = tpu.matmul %5, %6, %cst_8 {dimension_numbers = #tpu.dot_dimension_numbers<[1], [0], [0], [1], [0, 0, 1, 1], [], []>} : vector<16x16xf32>, vector<16x32xf32>, vector<16x32xf32> -> vector<16x32xf32>
    %8 = vector.broadcast %2 : vector<1x32xf32> to vector<16x32xf32>
    %9 = arith.addf %7, %8 : vector<16x32xf32>
    %cst_9 = arith.constant 0.000000e+00 : f32
    %10 = vector.broadcast %cst_9 : f32 to vector<16x32xf32>
    %11 = arith.maximumf %9, %10 : vector<16x32xf32>
    %c1 = arith.constant 1 : index
    %c0_10 = arith.constant 0 : index
    %c0_11 = arith.constant 0 : index
    %12 = vector.load %arg0[%c1, %c0_10, %c0_11] : memref<4x16x16xf32, #tpu.memory_space<vmem>>, vector<1x16x16xf32>
    %13 = vector.shape_cast %12 : vector<1x16x16xf32> to vector<16x16xf32>
    %14 = vector.extract_strided_slice %3 {offsets = [16, 0], sizes = [16, 32], strides = [1, 1]} : vector<64x32xf32> to vector<16x32xf32>
    %cst_12 = arith.constant dense<0.000000e+00> : vector<16x32xf32>
    %15 = tpu.matmul %13, %14, %cst_12 {dimension_numbers = #tpu.dot_dimension_numbers<[1], [0], [0], [1], [0, 0, 1, 1], [], []>} : vector<16x16xf32>, vector<16x32xf32>, vector<16x32xf32> -> vector<16x32xf32>
    %16 = vector.broadcast %2 : vector<1x32xf32> to vector<16x32xf32>
    %17 = arith.addf %15, %16 : vector<16x32xf32>
    %cst_13 = arith.constant 0.000000e+00 : f32
    %18 = vector.broadcast %cst_13 : f32 to vector<16x32xf32>
    %19 = arith.maximumf %17, %18 : vector<16x32xf32>
    %c2 = arith.constant 2 : index
    %c0_14 = arith.constant 0 : index
    %c0_15 = arith.constant 0 : index
    %20 = vector.load %arg0[%c2, %c0_14, %c0_15] : memref<4x16x16xf32, #tpu.memory_space<vmem>>, vector<1x16x16xf32>
    %21 = vector.shape_cast %20 : vector<1x16x16xf32> to vector<16x16xf32>
    %22 = vector.extract_strided_slice %3 {offsets = [32, 0], sizes = [16, 32], strides = [1, 1]} : vector<64x32xf32> to vector<16x32xf32>
    %cst_16 = arith.constant dense<0.000000e+00> : vector<16x32xf32>
    %23 = tpu.matmul %21, %22, %cst_16 {dimension_numbers = #tpu.dot_dimension_numbers<[1], [0], [0], [1], [0, 0, 1, 1], [], []>} : vector<16x16xf32>, vector<16x32xf32>, vector<16x32xf32> -> vector<16x32xf32>
    %24 = vector.broadcast %2 : vector<1x32xf32> to vector<16x32xf32>
    %25 = arith.addf %23, %24 : vector<16x32xf32>
    %cst_17 = arith.constant 0.000000e+00 : f32
    %26 = vector.broadcast %cst_17 : f32 to vector<16x32xf32>
    %27 = arith.maximumf %25, %26 : vector<16x32xf32>
    %c3 = arith.constant 3 : index
    %c0_18 = arith.constant 0 : index
    %c0_19 = arith.constant 0 : index
    %28 = vector.load %arg0[%c3, %c0_18, %c0_19] : memref<4x16x16xf32, #tpu.memory_space<vmem>>, vector<1x16x16xf32>
    %29 = vector.shape_cast %28 : vector<1x16x16xf32> to vector<16x16xf32>
    %30 = vector.extract_strided_slice %3 {offsets = [48, 0], sizes = [16, 32], strides = [1, 1]} : vector<64x32xf32> to vector<16x32xf32>
    %cst_20 = arith.constant dense<0.000000e+00> : vector<16x32xf32>
    %31 = tpu.matmul %29, %30, %cst_20 {dimension_numbers = #tpu.dot_dimension_numbers<[1], [0], [0], [1], [0, 0, 1, 1], [], []>} : vector<16x16xf32>, vector<16x32xf32>, vector<16x32xf32> -> vector<16x32xf32>
    %32 = vector.broadcast %2 : vector<1x32xf32> to vector<16x32xf32>
    %33 = arith.addf %31, %32 : vector<16x32xf32>
    %cst_21 = arith.constant 0.000000e+00 : f32
    %34 = vector.broadcast %cst_21 : f32 to vector<16x32xf32>
    %35 = arith.maximumf %33, %34 : vector<16x32xf32>
    %36 = tpu.concatenate %11, %19, %27, %35 in 0 : vector<16x32xf32>, vector<16x32xf32>, vector<16x32xf32>, vector<16x32xf32> -> vector<64x32xf32>
    %c0_22 = arith.constant 0 : index
    %c0_23 = arith.constant 0 : index
    %37 = vector.load %arg4[%c0_22, %c0_23] : memref<32x8xf32, #tpu.memory_space<vmem>>, vector<32x8xf32>
    %c0_24 = arith.constant 0 : index
    %c0_25 = arith.constant 0 : index
    %38 = vector.load %arg5[%c0_24, %c0_25] : memref<1x8xf32, #tpu.memory_space<vmem>>, vector<1x8xf32>
    %cst_26 = arith.constant dense<0.000000e+00> : vector<64x8xf32>
    %39 = tpu.matmul %36, %37, %cst_26 {dimension_numbers = #tpu.dot_dimension_numbers<[1], [0], [0], [1], [0, 0, 1, 1], [], []>} : vector<64x32xf32>, vector<32x8xf32>, vector<64x8xf32> -> vector<64x8xf32>
    %c0_27 = arith.constant 0 : index
    %c0_28 = arith.constant 0 : index
    %c0_29 = arith.constant 0 : index
    %40 = vector.load %arg0[%c0_27, %c0_28, %c0_29] : memref<4x16x16xf32, #tpu.memory_space<vmem>>, vector<1x16x16xf32>
    %41 = vector.shape_cast %40 : vector<1x16x16xf32> to vector<16x16xf32>
    %42 = vector.extract_strided_slice %39 {offsets = [0, 0], sizes = [16, 8], strides = [1, 1]} : vector<64x8xf32> to vector<16x8xf32>
    %cst_30 = arith.constant dense<0.000000e+00> : vector<16x8xf32>
    %43 = tpu.matmul %41, %42, %cst_30 {dimension_numbers = #tpu.dot_dimension_numbers<[1], [0], [0], [1], [0, 0, 1, 1], [], []>} : vector<16x16xf32>, vector<16x8xf32>, vector<16x8xf32> -> vector<16x8xf32>
    %44 = vector.broadcast %38 : vector<1x8xf32> to vector<16x8xf32>
    %45 = arith.addf %43, %44 : vector<16x8xf32>
    %c1_31 = arith.constant 1 : index
    %c0_32 = arith.constant 0 : index
    %c0_33 = arith.constant 0 : index
    %46 = vector.load %arg0[%c1_31, %c0_32, %c0_33] : memref<4x16x16xf32, #tpu.memory_space<vmem>>, vector<1x16x16xf32>
    %47 = vector.shape_cast %46 : vector<1x16x16xf32> to vector<16x16xf32>
    %48 = vector.extract_strided_slice %39 {offsets = [16, 0], sizes = [16, 8], strides = [1, 1]} : vector<64x8xf32> to vector<16x8xf32>
    %cst_34 = arith.constant dense<0.000000e+00> : vector<16x8xf32>
    %49 = tpu.matmul %47, %48, %cst_34 {dimension_numbers = #tpu.dot_dimension_numbers<[1], [0], [0], [1], [0, 0, 1, 1], [], []>} : vector<16x16xf32>, vector<16x8xf32>, vector<16x8xf32> -> vector<16x8xf32>
    %50 = vector.broadcast %38 : vector<1x8xf32> to vector<16x8xf32>
    %51 = arith.addf %49, %50 : vector<16x8xf32>
    %c2_35 = arith.constant 2 : index
    %c0_36 = arith.constant 0 : index
    %c0_37 = arith.constant 0 : index
    %52 = vector.load %arg0[%c2_35, %c0_36, %c0_37] : memref<4x16x16xf32, #tpu.memory_space<vmem>>, vector<1x16x16xf32>
    %53 = vector.shape_cast %52 : vector<1x16x16xf32> to vector<16x16xf32>
    %54 = vector.extract_strided_slice %39 {offsets = [32, 0], sizes = [16, 8], strides = [1, 1]} : vector<64x8xf32> to vector<16x8xf32>
    %cst_38 = arith.constant dense<0.000000e+00> : vector<16x8xf32>
    %55 = tpu.matmul %53, %54, %cst_38 {dimension_numbers = #tpu.dot_dimension_numbers<[1], [0], [0], [1], [0, 0, 1, 1], [], []>} : vector<16x16xf32>, vector<16x8xf32>, vector<16x8xf32> -> vector<16x8xf32>
    %56 = vector.broadcast %38 : vector<1x8xf32> to vector<16x8xf32>
    %57 = arith.addf %55, %56 : vector<16x8xf32>
    %c3_39 = arith.constant 3 : index
    %c0_40 = arith.constant 0 : index
    %c0_41 = arith.constant 0 : index
    %58 = vector.load %arg0[%c3_39, %c0_40, %c0_41] : memref<4x16x16xf32, #tpu.memory_space<vmem>>, vector<1x16x16xf32>
    %59 = vector.shape_cast %58 : vector<1x16x16xf32> to vector<16x16xf32>
    %60 = vector.extract_strided_slice %39 {offsets = [48, 0], sizes = [16, 8], strides = [1, 1]} : vector<64x8xf32> to vector<16x8xf32>
    %cst_42 = arith.constant dense<0.000000e+00> : vector<16x8xf32>
    %61 = tpu.matmul %59, %60, %cst_42 {dimension_numbers = #tpu.dot_dimension_numbers<[1], [0], [0], [1], [0, 0, 1, 1], [], []>} : vector<16x16xf32>, vector<16x8xf32>, vector<16x8xf32> -> vector<16x8xf32>
    %62 = vector.broadcast %38 : vector<1x8xf32> to vector<16x8xf32>
    %63 = arith.addf %61, %62 : vector<16x8xf32>
    %64 = tpu.concatenate %45, %51, %57, %63 in 1 : vector<16x8xf32>, vector<16x8xf32>, vector<16x8xf32>, vector<16x8xf32> -> vector<16x32xf32>
    %c0_43 = arith.constant 0 : index
    %c0_44 = arith.constant 0 : index
    %65 = vector.load %arg6[%c0_43, %c0_44] : memref<32x8xf32, #tpu.memory_space<vmem>>, vector<32x8xf32>
    %cst_45 = arith.constant dense<0.000000e+00> : vector<16x8xf32>
    %66 = tpu.matmul %64, %65, %cst_45 {dimension_numbers = #tpu.dot_dimension_numbers<[1], [0], [0], [1], [0, 0, 1, 1], [], []>} : vector<16x32xf32>, vector<32x8xf32>, vector<16x8xf32> -> vector<16x8xf32>
    %c0_46 = arith.constant 0 : index
    %c0_47 = arith.constant 0 : index
    %67 = vector.load %arg7[%c0_46, %c0_47] : memref<1x8xf32, #tpu.memory_space<vmem>>, vector<1x8xf32>
    %68 = vector.broadcast %67 : vector<1x8xf32> to vector<16x8xf32>
    %69 = arith.addf %66, %68 : vector<16x8xf32>
    %c0_48 = arith.constant 0 : index
    %c0_49 = arith.constant 0 : index
    %70 = vector.load %arg8[%c0_48, %c0_49] : memref<16x8xf32, #tpu.memory_space<vmem>>, vector<16x8xf32>
    tpu.vector_store %arg8[%c0_48, %c0_49], %69 {strides = array<i32>} : memref<16x8xf32, #tpu.memory_space<vmem>>, vector<16x8xf32>,
    return
  }
}

</mosaic_0001>

<bundles_post_ra>
// kernel: tpu_custom_call.1
= control target key start
LH: loop header
LB: loop body
LE: loop exit
PB: predicated region body
PF: predicated region fallthrough
CT: control target
= control target key end

     0   :  { %vm39_vm0 = vcmask 64512   ;;  %vm110_vm1 = vcmask 130048   ;;  %vm249_vm2 = vcmask 261120   ;;  %s532_s23 = smov 8   ;;  %s533_s24 = smov 16   ;;  %vm438_vm3 = vcmask 195584   ;;  %s742_s2 = inlined_call_operand.vmem [shape: f32[8,32], index: 2, kind: input, shape index: {}]   ;;  %s743_s1 = inlined_call_operand.vmem [shape: f32[64,8], index: 1, kind: input, shape index: {}]   ;;  %s744_s3 = inlined_call_operand.vmem [shape: f32[1,32], index: 3, kind: input, shape index: {}]   ;;  %s745_s0 = inlined_call_operand.vmem [shape: f32[4,16,16], index: 0, kind: input, shape index: {}]   ;;  %s746_s4 = inlined_call_operand.vmem [shape: f32[32,8], index: 4, kind: input, shape index: {}]   ;;  %s747_s5 = inlined_call_operand.vmem [shape: f32[1,8], index: 5, kind: input, shape index: {}]   ;;  %s748_s7 = inlined_call_operand.vmem [shape: f32[1,8], index: 7, kind: input, shape index: {}]   ;;  %s749_s6 = inlined_call_operand.vmem [shape: f32[32,8], index: 6, kind: input, shape index: {}]   ;;  %s750_s8 = inlined_call_operand.vmem [shape: f32[16,8], index: 8, kind: output, shape index: {}]  }
   0x1   :  { %v37_v0 = vld [vmem:[%s742_s2] sm:$0xff]  ;;  %v30_v2 = vld [vmem:[%s743_s1 + $0x8] sm:$0xff]  ;;  %v31_v3 = vld [vmem:[%s743_s1 + $0x10] sm:$0xff]  ;;  %s534_s25 = smov 24  }
   0x2   :  { %v29_v1 = vld [vmem:[%s743_s1] sm:$0xff]  ;;  %79 = vmatpush.msra.mxu0 %v37_v0  ;;  %v32_v4 = vld [vmem:[%s743_s1 + $0x18] sm:$0xff]  ;;  %v34_v6 = vld [vmem:[%s743_s1 + $0x28] sm:$0xff] }
   0x3   :  { %484 = vmatmul.msk.f32.vlgmr.msra.gmra.mxu0 %vm39_vm0, %v29_v1  ;;  %v33_v5 = vld [vmem:[%s743_s1 + $0x20] sm:$0xff]  ;;  %v35_v7 = vld [vmem:[%s743_s1 + $0x30] sm:$0xff]  ;;  %v36_v8 = vld [vmem:[%s743_s1 + $0x38] sm:$0xff] }
   0x4   :  { %v618_v11 = vld [vmem:[%s745_s0] sm:$0xff]  ;;  %v625_v13 = vld [vmem:[%s745_s0 + $0x8] sm:$0xff]  ;;  %v632_v15 = vld [vmem:[%s745_s0 + $0x10] sm:$0xff] }
   0x5   :  { %v637_v16 = vld [vmem:[%s745_s0 + $0x18] sm:$0xff]  ;;  %v649_v20 = vld [vmem:[%s745_s0 + $0x20] sm:$0xff]  ;;  %v656_v22 = vld [vmem:[%s745_s0 + $0x28] sm:$0xff] }
   0x6   :  { %v247_v18 = vld [vmem:[%s746_s4 + $0x18] sm:$0xff]  ;;  %v663_v24 = vld [vmem:[%s745_s0 + $0x30] sm:$0xff]  ;;  %v245_v27 = vld [vmem:[%s746_s4 + $0x8] sm:$0xff] }
   0x7   :  { %v670_v25 = vld [vmem:[%s745_s0 + $0x38] sm:$0xff]  ;;  %v246_v26 = vld [vmem:[%s746_s4 + $0x10] sm:$0xff]  ;;  %v244_v28 = vld [vmem:[%s746_s4] sm:$0xff] }
   0x8   :  { %v529_v29 = vld [vmem:[%s744_s3] ss:$0 sm:$0xff] }
   0x9   :  { %v530_v62 = vld [vmem:[%s747_s5] ss:$0 sm:$0xff] }
   0xb   :  { %485 = vmatmul.msk.f32.gmra.mxu0 %vm39_vm0, %v30_v2 }
  0x13   :  { %486 = vmatmul.msk.f32.gmra.mxu0 %vm39_vm0, %v31_v3 }
  0x1b   :  { %487 = vmatmul.msk.f32.gmra.mxu0 %vm39_vm0, %v32_v4 }
  0x23   :  { %488 = vmatmul.msk.f32.gmra.mxu0 %vm39_vm0, %v33_v5 }
  0x2b   :  { %489 = vmatmul.msk.f32.gmra.mxu0 %vm39_vm0, %v34_v6 }
  0x33   :  { %490 = vmatmul.msk.f32.gmra.mxu0 %vm39_vm0, %v35_v7 }
  0x3b   :  { %491 = vmatmul.msk.f32.gmra.mxu0 %vm39_vm0, %v36_v8 }
  0x80   :  { %v81_v9 = vpop.f32.mrf.mxu0 }
  0x88   :  { %v84_v10 = vpop.f32.mrf.mxu0 }
  0x89   :  { %131 = vmatpush.msra.mxu1 %v84_v10 }
  0x8b   :  { %132 = vmatpush.msra.mxu1 %v81_v9 }
  0x8c   :  { %492 = vmatmul.msk.f32.vlgmr.msra.gmra.mxu1 %vm110_vm1, %v618_v11 }
  0x90   :  { %v87_v12 = vpop.f32.mrf.mxu0 }
  0x94   :  { %493 = vmatmul.msk.f32.gmra.mxu1 %vm110_vm1, %v625_v13 }
  0x98   :  { %v90_v14 = vpop.f32.mrf.mxu0 }
  0x99   :  { %165 = vmatpush.msrb.mxu0 %v90_v14  ;;  %524 = vmatpush.msra.mxu2 %v90_v14 }
  0x9b   :  { %166 = vmatpush.msrb.mxu0 %v87_v12  ;;  %525 = vmatpush.msra.mxu2 %v87_v12 }
  0x9c   :  { %496 = vmatmul.msk.f32.vlgmr.msrb.gmra.mxu0 %vm110_vm1, %v632_v15  ;;  %497 = vmatmul.msk.f32.vlgmr.msra.gmra.mxu2 %vm110_vm1, %v637_v16 }
  0x9d   :  { %286 = vmatpush.msrb.mxu2 %v247_v18  ;;  %v441_v18 = vld [vmem:[%s749_s6] sm:$0xff] }
  0x9f   :  { %287 = vmatpush.msrb.mxu2 %v246_v26 }
  0xa0   :  { %v93_v17 = vpop.f32.mrf.mxu0 }
  0xa1   :  { %288 = vmatpush.msrb.mxu2 %v245_v27 }
  0xa3   :  { %289 = vmatpush.msrb.mxu2 %v244_v28 }
  0xa8   :  { %v96_v19 = vpop.f32.mrf.mxu0 }
  0xa9   :  { %199 = vmatpush.msra.mxu3 %v96_v19 }
  0xab   :  { %200 = vmatpush.msra.mxu3 %v93_v17  ;;  %v442_v17 = vld [vmem:[%s749_s6 + $0x8] sm:$0xff] }
  0xac   :  { %500 = vmatmul.msk.f32.vlgmr.msra.gmra.mxu3 %vm110_vm1, %v649_v20 }
  0xb0   :  { %v99_v21 = vpop.f32.mrf.mxu0 }
  0xb4   :  { %501 = vmatmul.msk.f32.gmra.mxu3 %vm110_vm1, %v656_v22 }
  0xb8   :  { %v102_v23 = vpop.f32.mrf.mxu0 }
  0xb9   :  { %233 = vmatpush.msrb.mxu1 %v102_v23 }
  0xbb   :  { %234 = vmatpush.msrb.mxu1 %v99_v21 }
  0xbc   :  { %504 = vmatmul.msk.f32.vlgmr.msrb.gmra.mxu1 %vm110_vm1, %v663_v24 }
  0xc4   :  { %505 = vmatmul.msk.f32.gmra.mxu1 %vm110_vm1, %v670_v25 }
 0x109   :  { %v134_v30 = vpop.f32.mrf.mxu1 }
 0x10a   :  { %v135_v31 = vadd.f32 %v529_v29, %v134_v30 }
 0x10c   :  { %v140_v32 = vmax.f32 %v135_v31, 0.0  ;;  %v531_v31 = vld [vmem:[%s748_s7] ss:$0 sm:$0xff] }
 0x10e   :  { %506 = vmatmul.msk.f32.vlgmr.msrb.gmra.mxu2 %vm249_vm2, %v140_v32 }
 0x111   :  { %v137_v33 = vpop.f32.mrf.mxu1 }
 0x112   :  { %v138_v34 = vadd.f32 %v529_v29, %v137_v33 }
 0x114   :  { %v141_v35 = vmax.f32 %v138_v34, 0.0 }
 0x116   :  { %507 = vmatmul.msk.f32.gmra.mxu2 %vm249_vm2, %v141_v35 }
 0x119   :  { %v168_v36 = vpop.f32.mrf.mxu0 }
 0x11a   :  { %v169_v37 = vadd.f32 %v529_v29, %v168_v36 }
 0x11c   :  { %v174_v38 = vmax.f32 %v169_v37, 0.0 }
 0x11e   :  { %508 = vmatmul.msk.f32.gmra.mxu2 %vm249_vm2, %v174_v38 }
 0x11f   :  { %v171_v39 = vpop.f32.mrf.mxu2 }
 0x120   :  { %v172_v40 = vadd.f32 %v529_v29, %v171_v39 }
 0x122   :  { %v175_v41 = vmax.f32 %v172_v40, 0.0 }
 0x126   :  { %509 = vmatmul.msk.f32.gmra.mxu2 %vm249_vm2, %v175_v41 }
 0x12f   :  { %v202_v42 = vpop.f32.mrf.mxu3 }
 0x130   :  { %v203_v43 = vadd.f32 %v529_v29, %v202_v42 }
 0x132   :  { %v208_v44 = vmax.f32 %v203_v43, 0.0 }
 0x134   :  { %510 = vmatmul.msk.f32.gmra.mxu2 %vm249_vm2, %v208_v44 }
 0x137   :  { %v205_v45 = vpop.f32.mrf.mxu3 }
 0x138   :  { %v206_v46 = vadd.f32 %v529_v29, %v205_v45 }
 0x139   :  { %v236_v47 = vpop.f32.mrf.mxu1 }
 0x13a   :  { %v209_v48 = vmax.f32 %v206_v46, 0.0  ;;  %v237_v49 = vadd.f32 %v529_v29, %v236_v47 }
 0x13c   :  { %511 = vmatmul.msk.f32.gmra.mxu2 %vm249_vm2, %v209_v48  ;;  %v242_v50 = vmax.f32 %v237_v49, 0.0 }
 0x141   :  { %v239_v51 = vpop.f32.mrf.mxu1 }
 0x142   :  { %v240_v52 = vadd.f32 %v529_v29, %v239_v51 }
 0x144   :  { %512 = vmatmul.msk.f32.gmra.mxu2 %vm249_vm2, %v242_v50  ;;  %v243_v53 = vmax.f32 %v240_v52, 0.0 }
 0x14c   :  { %513 = vmatmul.msk.f32.gmra.mxu2 %vm249_vm2, %v243_v53 }
 0x191   :  { %v291_v54 = vpop.f32.mrf.mxu2 }
 0x199   :  { %v294_v55 = vpop.f32.mrf.mxu2 }
 0x19a   :  { %332 = vmatpush.msrb.mxu3 %v294_v55 }
 0x19c   :  { %333 = vmatpush.msrb.mxu3 %v291_v54 }
 0x19d   :  { %514 = vmatmul.msk.f32.vlgmr.msrb.gmra.mxu3 %vm110_vm1, %v618_v11 }
 0x1a1   :  { %v297_v56 = vpop.f32.mrf.mxu2 }
 0x1a5   :  { %515 = vmatmul.msk.f32.gmra.mxu3 %vm110_vm1, %v625_v13 }
 0x1a9   :  { %v300_v57 = vpop.f32.mrf.mxu2 }
 0x1aa   :  { %355 = vmatpush.msra.mxu1 %v300_v57 }
 0x1ac   :  { %356 = vmatpush.msra.mxu1 %v297_v56 }
 0x1ad   :  { %516 = vmatmul.msk.f32.vlgmr.msra.gmra.mxu1 %vm110_vm1, %v632_v15  ;;  %v444_v15 = vld [vmem:[%s749_s6 + $0x18] sm:$0xff] }
 0x1b5   :  { %517 = vmatmul.msk.f32.gmra.mxu1 %vm110_vm1, %v637_v16  ;;  %v443_v16 = vld [vmem:[%s749_s6 + $0x10] sm:$0xff] }
 0x1b7   :  { %v303_v58 = vpop.f32.mrf.mxu2 }
 0x1bf   :  { %v306_v59 = vpop.f32.mrf.mxu2 }
 0x1c0   :  { %378 = vmatpush.msra.mxu3 %v306_v59 }
 0x1c2   :  { %379 = vmatpush.msra.mxu3 %v303_v58 }
 0x1c3   :  { %518 = vmatmul.msk.f32.vlgmr.msra.gmra.mxu3 %vm110_vm1, %v649_v20 }
 0x1c4   :  { %467 = vmatpush.msrb.mxu3 %v444_v15 }
 0x1c6   :  { %468 = vmatpush.msrb.mxu3 %v443_v16 }
 0x1c7   :  { %v309_v60 = vpop.f32.mrf.mxu2 }
 0x1c8   :  { %469 = vmatpush.msrb.mxu3 %v442_v17 }
 0x1ca   :  { %470 = vmatpush.msrb.mxu3 %v441_v18 }
 0x1cb   :  { %519 = vmatmul.msk.f32.gmra.mxu3 %vm110_vm1, %v656_v22 }
 0x1cf   :  { %v312_v61 = vpop.f32.mrf.mxu2 }
 0x1d0   :  { %401 = vmatpush.msrb.mxu1 %v312_v61 }
 0x1d2   :  { %402 = vmatpush.msrb.mxu1 %v309_v60 }
 0x1d3   :  { %520 = vmatmul.msk.f32.vlgmr.msrb.gmra.mxu1 %vm110_vm1, %v663_v24 }
 0x1db   :  { %521 = vmatmul.msk.f32.gmra.mxu1 %vm110_vm1, %v670_v25 }
 0x220   :  { %v335_v63 = vpop.f32.mrf.mxu3 }
 0x221   :  { %v336_v0 = vadd.f32 %v530_v62, %v335_v63 }
 0x228   :  { %v338_v1 = vpop.f32.mrf.mxu3 }
 0x229   :  { %v339_v2 = vadd.f32 %v530_v62, %v338_v1 }
 0x22a   :  { %v358_v3 = vpop.f32.mrf.mxu1 }
 0x22b   :  { %v359_v4 = vadd.f32 %v530_v62, %v358_v3 }
 0x22d   :  { %412 = vrot.lane.b32.xlu0 %v359_v4, %s532_s23 }
 0x232   :  { %v361_v6 = vpop.f32.mrf.mxu1 }
 0x233   :  { %v362_v13 = vadd.f32 %v530_v62, %v361_v6 }
 0x246   :  { %v381_v5 = vpop.f32.mrf.mxu3 }
 0x247   :  { %v382_v7 = vadd.f32 %v530_v62, %v381_v5 }
 0x249   :  { %420 = vrot.lane.b32.xlu0 %v382_v7, %s533_s24 }
 0x24e   :  { %v384_v8 = vpop.f32.mrf.mxu3 }
 0x24f   :  { %v385_v9 = vadd.f32 %v530_v62, %v384_v8 }
 0x250   :  { %v404_v10 = vpop.f32.mrf.mxu1 }
 0x251   :  { %v405_v11 = vadd.f32 %v530_v62, %v404_v10  ;;  %422 = vrot.lane.b32.xlu2 %v385_v9, %s533_s24 }
 0x253   :  { %428 = vrot.lane.b32.xlu1 %v405_v11, %s534_s25 }
 0x258   :  { %v407_v12 = vpop.f32.mrf.mxu1 }
 0x259   :  { %v408_v14 = vadd.f32 %v530_v62, %v407_v12 }
 0x25b   :  { %414 = vrot.lane.b32.xlu1 %v362_v13, %s532_s23  ;;  %430 = vrot.lane.b32.xlu2 %v408_v14, %s534_s25 }
 0x29f   :  { %v413_v19 = vpop.permute.xlu0 %412 }
 0x2a0   :  { %v434_v22 = vsel %vm39_vm0, %v336_v0, %v413_v19 }
 0x2ab   :  { %v423_v21 = vpop.permute.xlu2 %422 }
 0x2b5   :  { %v431_v27 = vpop.permute.xlu2 %430 }
 0x2bb   :  { %v421_v20 = vpop.permute.xlu0 %420 }
 0x2bc   :  { %v436_v23 = vsel %vm110_vm1, %v434_v22, %v421_v20 }
 0x2c5   :  { %v429_v24 = vpop.permute.xlu1 %428 }
 0x2c6   :  { %v439_v25 = vsel %vm438_vm3, %v436_v23, %v429_v24 }
 0x2c7   :  { %522 = vmatmul.msk.f32.vlgmr.msrb.gmra.mxu3 %vm249_vm2, %v439_v25 }
 0x2cd   :  { %v415_v26 = vpop.permute.xlu1 %414 }
 0x2ce   :  { %v435_v28 = vsel %vm39_vm0, %v339_v2, %v415_v26 }
 0x2cf   :  { %v437_v29 = vsel %vm110_vm1, %v435_v28, %v423_v21 }
 0x2d0   :  { %v440_v30 = vsel %vm438_vm3, %v437_v29, %v431_v27 }
 0x2d1   :  { %523 = vmatmul.msk.f32.gmra.mxu3 %vm249_vm2, %v440_v30 }
 0x34a   :  { %v472_v32 = vpop.f32.mrf.mxu3 }
 0x34b   :  { %v473_v33 = vadd.f32 %v531_v31, %v472_v32 }
 0x34d   :  { %478 = vst.msk [vmem:[%s750_s8] sm:$0xff] %vm39_vm0, %v473_v33 }
 0x354   :  { %v475_v34 = vpop.f32.mrf.mxu3 }
 0x355   :  { %v476_v35 = vadd.f32 %v531_v31, %v475_v34 }
 0x357   :  { %479 = vst.msk [vmem:[%s750_s8 + $0x8] sm:$0xff] %vm39_vm0, %v476_v35 }

</bundles_post_ra>
